<compile_context>
chip_gen: v7x
topology: tpu7x:2x2x1
jax: 0.10.0
libtpu: 0.0.40
codegen_flags: <defaults>
</compile_context>

<pallas_src>
import functools

import jax
import jax.numpy as jnp
from jax.experimental import pallas as pl
from jax.experimental.pallas import tpu as pltpu


def _round_up(x, m):
    return ((x + m - 1) // m) * m


def _pad2d(a, rows, cols):
    r, c = a.shape
    if r == rows and c == cols:
        return a
    return jnp.pad(a, ((0, rows - r), (0, cols - c)))


def _predictor_kernel(x_ref, w1_ref, b1_ref, w2_ref, b2_ref, out_ref, h_ref, *,
                      hidden_pad, pos_blocks):
    """Grid = (row_blocks, col_blocks).  h_ref caches both heads' layer-1 output."""
    j = pl.program_id(1)

    # Fused layer-1 for BOTH heads, computed once per row block (j == 0).
    # f32 accumulation + f32 bias add, then rounded once to the scratch dtype
    # (== compute dtype) so layer-2 reloads fewer bytes in bf16 mode.
    @pl.when(j == 0)
    def _():
        h = jnp.dot(x_ref[...], w1_ref[...],
                    preferred_element_type=jnp.float32) + b1_ref[...]
        h_ref[0] = h[:, :hidden_pad].astype(h_ref.dtype)   # pos-head hidden
        h_ref[1] = h[:, hidden_pad:].astype(h_ref.dtype)   # grp-head hidden

    # Which head does this output-column block belong to? (pos blocks come first)
    head = (j >= pos_blocks).astype(jnp.int32)
    h_head = h_ref[head]                                    # (tm, hidden_pad)

    out = jnp.dot(h_head, w2_ref[...],
                  preferred_element_type=jnp.float32) + b2_ref[...]
    out_ref[...] = out.astype(out_ref.dtype)


def predictor_forward(x, params, *, n_frames, n_particles, n_group_classes,
                      compute_dtype=jnp.float32, block_m=256, block_n=256):
    """Runs both heads in one pallas_call and applies the PyTorch .view() reshapes.

    Weights are stored pre-transposed as (in, out); biases as (1, out).
    compute_dtype controls the MXU operand dtype (f32 / bf16); accumulation and
    bias adds stay f32, output dtype matches x.dtype.
    """
    w1p, b1p, w2p, b2p, w1g, b1g, w2g, b2g = params
    B, d_in = x.shape
    hidden = w1p.shape[1]
    pos_out = w2p.shape[1]     # 3 * n_frames * n_particles
    grp_out = w2g.shape[1]     # n_group_classes * n_frames * n_particles

    itemsize = jnp.dtype(compute_dtype).itemsize
    out_itemsize = jnp.dtype(x.dtype).itemsize
    row_align = max(8, 32 // itemsize)         # 8 for f32, 16 for bf16 sublane packing
    lane = 128

    tn = _round_up(block_n, lane)              # output / W2 column tile
    d_in_pad = _round_up(d_in, lane)
    hidden_pad = _round_up(hidden, lane)
    pos_pad = _round_up(pos_out, tn)
    grp_pad = _round_up(grp_out, tn)
    total_pad = pos_pad + grp_pad
    pos_blocks = pos_pad // tn

    tm = min(_round_up(block_m, row_align), _round_up(B, row_align))
    B_pad = _round_up(B, tm)

    # --- fuse + pad parameters (zero padding keeps the math exact) -------------
    w1_c = jnp.concatenate([_pad2d(w1p, d_in_pad, hidden_pad),
                            _pad2d(w1g, d_in_pad, hidden_pad)], axis=1)
    b1_c = jnp.concatenate([_pad2d(b1p, 1, hidden_pad),
                            _pad2d(b1g, 1, hidden_pad)], axis=1).astype(jnp.float32)
    w2_c = jnp.concatenate([_pad2d(w2p, hidden_pad, pos_pad),
                            _pad2d(w2g, hidden_pad, grp_pad)], axis=1)
    b2_c = jnp.concatenate([_pad2d(b2p, 1, pos_pad),
                            _pad2d(b2g, 1, grp_pad)], axis=1).astype(jnp.float32)
    x_c = _pad2d(x, B_pad, d_in_pad)

    # MXU operands in compute_dtype (e.g. bf16 -> half the HBM weight bytes);
    # accumulation + bias adds stay f32.
    x_c = x_c.astype(compute_dtype)
    w1_c = w1_c.astype(compute_dtype)
    w2_c = w2_c.astype(compute_dtype)

    grid = (B_pad // tm, total_pad // tn)

    # --- VMEM budget (double-buffered streamed tiles + resident W1 + scratch) --
    est = (2 * (tm * d_in_pad + hidden_pad * tn) * itemsize      # x / W2 tiles, 2-buffered
           + 2 * (tn * 4 + tm * tn * out_itemsize)               # b2 tile + output tile
           + d_in_pad * 2 * hidden_pad * itemsize                # resident W1
           + 2 * hidden_pad * 4                                  # resident b1
           + 2 * tm * hidden_pad * itemsize)                     # h scratch (compute dtype)
    vmem_limit = int(min(max(2 * est, 32 * 2**20), 48 * 2**20))  # fits v7x's 64 MiB physical

    flops = 2 * B_pad * d_in_pad * (2 * hidden_pad) + 2 * B_pad * hidden_pad * total_pad
    bytes_accessed = (x_c.size * itemsize + w1_c.size * itemsize + w2_c.size * itemsize
                      + b1_c.size * 4 + b2_c.size * 4 + B_pad * total_pad * out_itemsize)

    kernel = functools.partial(_predictor_kernel,
                               hidden_pad=hidden_pad, pos_blocks=pos_blocks)

    out_pad = pl.pallas_call(
        kernel,
        grid_spec=pltpu.PrefetchScalarGridSpec(
            num_scalar_prefetch=0,
            grid=grid,
            in_specs=[
                pl.BlockSpec((tm, d_in_pad), lambda i, j: (i, 0)),              # x row block
                pl.BlockSpec((d_in_pad, 2 * hidden_pad), lambda i, j: (0, 0)),  # fused W1 (resident)
                pl.BlockSpec((1, 2 * hidden_pad), lambda i, j: (0, 0)),         # fused b1 (resident)
                pl.BlockSpec((hidden_pad, tn), lambda i, j: (0, j)),            # W2 column tile (streamed)
                pl.BlockSpec((1, tn), lambda i, j: (0, j)),                     # b2 column tile
            ],
            out_specs=pl.BlockSpec((tm, tn), lambda i, j: (i, j)),              # lane-dense output
            scratch_shapes=[pltpu.VMEM((2, tm, hidden_pad), compute_dtype)],    # cached layer-1 (both heads)
        ),
        out_shape=jax.ShapeDtypeStruct((B_pad, total_pad), x.dtype),
        compiler_params=pltpu.CompilerParams(
            dimension_semantics=("parallel", "arbitrary"),
            vmem_limit_bytes=vmem_limit),
        cost_estimate=pl.CostEstimate(flops=int(flops), transcendentals=0,
                                      bytes_accessed=int(bytes_accessed)),
    )(x_c, w1_c, b1_c, w2_c, b2_c)

    pos_flat = out_pad[:B, :pos_out]
    grp_flat = out_pad[:B, pos_pad:pos_pad + grp_out]
    pred_pos = pos_flat.reshape(-1, n_frames, 3, n_particles)
    pred_grp = grp_flat.reshape(-1, n_frames, n_particles, n_group_classes)
    return pred_pos, pred_grp


def init_params(key, input_size, hidden_size, n_particles, n_frames, n_group_classes,
                dtype=jnp.float32):
    """Deterministic synthetic parameters (shapes match the nn.Module's Linears)."""
    pos_out = 3 * n_frames * n_particles
    grp_out = n_group_classes * n_frames * n_particles
    ks = jax.random.split(key, 8)
    scale1 = 1.0 / jnp.sqrt(input_size)
    scale2 = 1.0 / jnp.sqrt(hidden_size)
    w1p = jax.random.uniform(ks[0], (input_size, hidden_size), dtype, -scale1, scale1)
    b1p = jax.random.uniform(ks[1], (1, hidden_size), dtype, -scale1, scale1)
    w2p = jax.random.uniform(ks[2], (hidden_size, pos_out), dtype, -scale2, scale2)
    b2p = jax.random.uniform(ks[3], (1, pos_out), dtype, -scale2, scale2)
    w1g = jax.random.uniform(ks[4], (input_size, hidden_size), dtype, -scale1, scale1)
    b1g = jax.random.uniform(ks[5], (1, hidden_size), dtype, -scale1, scale1)
    w2g = jax.random.uniform(ks[6], (hidden_size, grp_out), dtype, -scale2, scale2)
    b2g = jax.random.uniform(ks[7], (1, grp_out), dtype, -scale2, scale2)
    return (w1p, b1p, w2p, b2p, w1g, b1g, w2g, b2g)


if __name__ == "__main__":
    # Small shapes consistent with the module's forward.
    B = 4
    input_size = 32
    hidden_size = 32
    n_particles = 8
    n_frames = 1
    n_group_classes = 3

    key = jax.random.PRNGKey(0)
    k_x, k_p = jax.random.split(key)
    x = jax.random.normal(k_x, (B, input_size), jnp.float32)
    params = init_params(k_p, input_size, hidden_size,
                         n_particles, n_frames, n_group_classes)

    # Pure-JAX reference (same math, no Pallas).
    w1p, b1p, w2p, b2p, w1g, b1g, w2g, b2g = params
    ref_pos = ((x @ w1p + b1p) @ w2p + b2p).reshape(-1, n_frames, 3, n_particles)
    ref_grp = ((x @ w1g + b1g) @ w2g + b2g).reshape(-1, n_frames, n_particles, n_group_classes)

    # f32 path: bit-for-bit-ish vs reference.
    pred_pos, pred_grp = predictor_forward(
        x, params,
        n_frames=n_frames, n_particles=n_particles,
        n_group_classes=n_group_classes, compute_dtype=jnp.float32)
    jax.block_until_ready((pred_pos, pred_grp))

    assert pred_pos.shape == (B, n_frames, 3, n_particles)
    assert pred_grp.shape == (B, n_frames, n_particles, n_group_classes)
    assert jnp.allclose(pred_pos, ref_pos, atol=1e-4, rtol=1e-4)
    assert jnp.allclose(pred_grp, ref_grp, atol=1e-4, rtol=1e-4)

    # bf16 operand path (f32 accumulation) - the bandwidth-bound optimization.
    pred_pos16, pred_grp16 = predictor_forward(
        x, params,
        n_frames=n_frames, n_particles=n_particles,
        n_group_classes=n_group_classes, compute_dtype=jnp.bfloat16)
    jax.block_until_ready((pred_pos16, pred_grp16))

    assert jnp.allclose(pred_pos16, ref_pos, atol=7e-2, rtol=7e-2)
    assert jnp.allclose(pred_grp16, ref_grp, atol=7e-2, rtol=7e-2)

    print("KERNEL_OK")
</pallas_src>

<mosaic_0001>
module attributes {stable_mosaic.version = 11 : i64} {
  func.func @_predictor_kernel(%arg0: i32, %arg1: i32, %arg2: memref<8x128xf32, #tpu.memory_space<vmem>>, %arg3: memref<128x256xf32, #tpu.memory_space<vmem>>, %arg4: memref<1x256xf32, #tpu.memory_space<vmem>>, %arg5: memref<128x256xf32, #tpu.memory_space<vmem>>, %arg6: memref<1x256xf32, #tpu.memory_space<vmem>>, %arg7: memref<8x256xf32, #tpu.memory_space<vmem>>, %arg8: memref<2x8x128xf32, #tpu.memory_space<vmem>>) attributes {dimension_semantics = [#tpu.dimension_semantics<parallel>, #tpu.dimension_semantics<arbitrary>], iteration_bounds = array<i64: 1, 2>, scalar_prefetch = 0 : i64, scratch_operands = 1 : i64, tpu.core_type = #tpu.core_type<tc>, window_params = [{transform_indices = @transform_0, window_bounds = array<i64: 8, 128>}, {pipeline_mode = #tpu.pipeline_mode<synchronous>, transform_indices = @transform_1, window_bounds = array<i64: 128, 256>}, {pipeline_mode = #tpu.pipeline_mode<synchronous>, transform_indices = @transform_2, window_bounds = array<i64: 1, 256>}, {transform_indices = @transform_3, window_bounds = array<i64: 128, 256>}, {transform_indices = @transform_4, window_bounds = array<i64: 1, 256>}, {transform_indices = @transform_5, window_bounds = array<i64: 8, 256>}]} {
    %c0_i32 = arith.constant 0 : i32
    %0 = arith.cmpi eq, %arg1, %c0_i32 : i32
    %1 = arith.extui %0 : i1 to i32
    %c0_i32_0 = arith.constant 0 : i32
    %2 = arith.cmpi ne, %1, %c0_i32_0 : i32
    scf.if %2 {
      %c0_8 = arith.constant 0 : index
      %c0_9 = arith.constant 0 : index
      %14 = vector.load %arg2[%c0_8, %c0_9] : memref<8x128xf32, #tpu.memory_space<vmem>>, vector<8x128xf32>
      %c0_10 = arith.constant 0 : index
      %c0_11 = arith.constant 0 : index
      %15 = vector.load %arg3[%c0_10, %c0_11] : memref<128x256xf32, #tpu.memory_space<vmem>>, vector<128x256xf32>
      %cst_12 = arith.constant dense<0.000000e+00> : vector<8x256xf32>
      %16 = tpu.matmul %14, %15, %cst_12 {dimension_numbers = #tpu.dot_dimension_numbers<[1], [0], [0], [1], [0, 0, 1, 1], [], []>} : vector<8x128xf32>, vector<128x256xf32>, vector<8x256xf32> -> vector<8x256xf32>
      %c0_13 = arith.constant 0 : index
      %c0_14 = arith.constant 0 : index
      %17 = vector.load %arg4[%c0_13, %c0_14] : memref<1x256xf32, #tpu.memory_space<vmem>>, vector<1x256xf32>
      %18 = vector.broadcast %17 : vector<1x256xf32> to vector<8x256xf32>
      %19 = arith.addf %16, %18 : vector<8x256xf32>
      %20 = vector.extract_strided_slice %19 {offsets = [0, 0], sizes = [8, 128], strides = [1, 1]} : vector<8x256xf32> to vector<8x128xf32>
      %c0_15 = arith.constant 0 : index
      %c0_16 = arith.constant 0 : index
      %c0_17 = arith.constant 0 : index
      %21 = vector.load %arg8[%c0_15, %c0_16, %c0_17] : memref<2x8x128xf32, #tpu.memory_space<vmem>>, vector<1x8x128xf32>
      %22 = vector.shape_cast %21 : vector<1x8x128xf32> to vector<8x128xf32>
      %23 = vector.shape_cast %20 : vector<8x128xf32> to vector<1x8x128xf32>
      tpu.vector_store %arg8[%c0_15, %c0_16, %c0_17], %23 {strides = array<i32>} : memref<2x8x128xf32, #tpu.memory_space<vmem>>, vector<1x8x128xf32>,
      %24 = vector.extract_strided_slice %19 {offsets = [0, 128], sizes = [8, 128], strides = [1, 1]} : vector<8x256xf32> to vector<8x128xf32>
      %c1 = arith.constant 1 : index
      %c0_18 = arith.constant 0 : index
      %c0_19 = arith.constant 0 : index
      %25 = vector.load %arg8[%c1, %c0_18, %c0_19] : memref<2x8x128xf32, #tpu.memory_space<vmem>>, vector<1x8x128xf32>
      %26 = vector.shape_cast %25 : vector<1x8x128xf32> to vector<8x128xf32>
      %27 = vector.shape_cast %24 : vector<8x128xf32> to vector<1x8x128xf32>
      tpu.vector_store %arg8[%c1, %c0_18, %c0_19], %27 {strides = array<i32>} : memref<2x8x128xf32, #tpu.memory_space<vmem>>, vector<1x8x128xf32>,
    } else {
    }
    %c1_i32 = arith.constant 1 : i32
    %3 = arith.cmpi sge, %arg1, %c1_i32 : i32
    %4 = arith.extui %3 : i1 to i32
    %5 = arith.index_cast %4 : i32 to index
    %c0 = arith.constant 0 : index
    %c0_1 = arith.constant 0 : index
    %6 = vector.load %arg8[%5, %c0, %c0_1] : memref<2x8x128xf32, #tpu.memory_space<vmem>>, vector<1x8x128xf32>
    %7 = vector.shape_cast %6 : vector<1x8x128xf32> to vector<8x128xf32>
    %c0_2 = arith.constant 0 : index
    %c0_3 = arith.constant 0 : index
    %8 = vector.load %arg5[%c0_2, %c0_3] : memref<128x256xf32, #tpu.memory_space<vmem>>, vector<128x256xf32>
    %cst = arith.constant dense<0.000000e+00> : vector<8x256xf32>
    %9 = tpu.matmul %7, %8, %cst {dimension_numbers = #tpu.dot_dimension_numbers<[1], [0], [0], [1], [0, 0, 1, 1], [], []>} : vector<8x128xf32>, vector<128x256xf32>, vector<8x256xf32> -> vector<8x256xf32>
    %c0_4 = arith.constant 0 : index
    %c0_5 = arith.constant 0 : index
    %10 = vector.load %arg6[%c0_4, %c0_5] : memref<1x256xf32, #tpu.memory_space<vmem>>, vector<1x256xf32>
    %11 = vector.broadcast %10 : vector<1x256xf32> to vector<8x256xf32>
    %12 = arith.addf %9, %11 : vector<8x256xf32>
    %c0_6 = arith.constant 0 : index
    %c0_7 = arith.constant 0 : index
    %13 = vector.load %arg7[%c0_6, %c0_7] : memref<8x256xf32, #tpu.memory_space<vmem>>, vector<8x256xf32>
    tpu.vector_store %arg7[%c0_6, %c0_7], %12 {strides = array<i32>} : memref<8x256xf32, #tpu.memory_space<vmem>>, vector<8x256xf32>,
    return
  }
  func.func @transform_0(%arg0: i32, %arg1: i32) -> (i32, i32) {
    %c0_i32 = arith.constant 0 : i32
    %c0_i32_0 = arith.constant 0 : i32
    return %arg0, %c0_i32 : i32, i32
  }
  func.func @transform_1(%arg0: i32, %arg1: i32) -> (i32, i32) {
    %c0_i32 = arith.constant 0 : i32
    %c0_i32_0 = arith.constant 0 : i32
    %c0_i32_1 = arith.constant 0 : i32
    return %c0_i32, %c0_i32_0 : i32, i32
  }
  func.func @transform_2(%arg0: i32, %arg1: i32) -> (i32, i32) {
    %c0_i32 = arith.constant 0 : i32
    %c0_i32_0 = arith.constant 0 : i32
    %c0_i32_1 = arith.constant 0 : i32
    return %c0_i32, %c0_i32_0 : i32, i32
  }
  func.func @transform_3(%arg0: i32, %arg1: i32) -> (i32, i32) {
    %c0_i32 = arith.constant 0 : i32
    %c0_i32_0 = arith.constant 0 : i32
    return %c0_i32, %arg1 : i32, i32
  }
  func.func @transform_4(%arg0: i32, %arg1: i32) -> (i32, i32) {
    %c0_i32 = arith.constant 0 : i32
    %c0_i32_0 = arith.constant 0 : i32
    return %c0_i32, %arg1 : i32, i32
  }
  func.func @transform_5(%arg0: i32, %arg1: i32) -> (i32, i32) {
    %c0_i32 = arith.constant 0 : i32
    return %arg0, %arg1 : i32, i32
  }
}

</mosaic_0001>

<bundles_post_ra>
// kernel: tpu_custom_call.1
= control target key start
LH: loop header
LB: loop body
LE: loop exit
PB: predicated region body
PF: predicated region fallthrough
CT: control target
= control target key end

     0   :  { %10 = vsyncpa [#allocation4], 0  ;;  %s1397_s0 = inlined_call_operand.hbm [shape: f32[8,128], index: 0, kind: input, shape index: {}]   ;;  %s1398_s1 = inlined_call_operand.hbm [shape: f32[128,256], index: 1, kind: input, shape index: {}]   ;;  %s1399_s2 = inlined_call_operand.vmem [shape: f32[1,256], index: 2, kind: input, shape index: {}]   ;;  %s1400_s3 = inlined_call_operand.hbm [shape: f32[128,512], index: 3, kind: input, shape index: {}]   ;;  %s1401_s4 = inlined_call_operand.vmem [shape: f32[1,512], index: 4, kind: input, shape index: {}]   ;;  %s1402_s5 = inlined_call_operand.hbm [shape: f32[8,512], index: 5, kind: output, shape index: {}]  }
   0x1   :  { %11 = vsyncpa [#allocation7], 0 }
   0x2   :  { %12 = vsyncpa [#allocation5], 0 }
   0x3   :  { %14 = vsyncpa [#allocation5 + $0x1], 0  ;;  %s1078_s18 = smov 0   ;;  %s1080_s19 = smov 0  }
   0x4   :  { %s1082_s20 = smov 0   ;;  %s1084_s21 = smov 0  }
   0x5   :  { %s1086_s22 = smov 0   ;;  %s1088_s23 = smov 0  }
   0x6 LB: > { %s1109_s24 = sadd.s32 4294967295, %s1037_s23   ;;  %s686_s25 = sadd.s32 4294967294, %s1037_s23   ;;  %s1037_s23 = sphi %s1088_s23, %s20_s23   ;;  %s1033_s22 = sphi %s1086_s22, %s1435_s22   ;;  %s1029_s21 = sphi %s1084_s21, %s1434_s21   ;;  %s1025_s20 = sphi %s1082_s20, %s1433_s20   ;;  %s1021_s19 = sphi %s1080_s19, %s1432_s19   ;;  %s1017_s18 = sphi %s1078_s18, %s1431_s18  }
   0x7   : > { %p114_p0 = scmp.ne.s32.totalorder %s1025_s20, %s1021_s19  ;;  %p115_p1 = scmp.eq.s32.totalorder %s1037_s23, 0 }
   0x8   : > { %p120_p2 = scmp.ne.s32.totalorder %s1021_s19, %s1017_s18  ;;  %p1403_p3 = scmp.eq.s32.totalorder %s1109_s24, 0 }
   0x9   : > { %p172_p4 = scmp.eq.s32.totalorder %s1109_s24, 1  ;;  %p1120_p5 = por %p115_p1, %p114_p0 }
   0xa   : > { %p178_p6 = scmp.eq.s32.totalorder %s686_s25, 1  ;;  %p1126_p7 = por %p1403_p3, %p120_p2 }
   0xb   : > { %p1130_p8 = por %p172_p4, %p114_p0  ;;  %p687_p10 = scmp.ge.s32.totalorder %s1037_s23, 1 }
   0xc   : > { %s1411_s28 = scalar_select %p1126_p7, 1, 0 }
   0xd   : > { %s1412_s29 = scalar_select %p1130_p8, 1, 0 }
   0xe   : > { %p1134_p9 = por %p178_p6, %p120_p2  ;;  %p185_p11 = scmp.lt.s32.totalorder %s1037_s23, 3 }
   0xf   : > { %s1039_s7 = smov [#allocation3]   ;;  %p802_p1 = scmp.lt.s32.totalorder %s1037_s23, 2 }
  0x10   : > { %s1413_s30 = scalar_select %p1134_p9, 1, 0 }
  0x11   : > { %p1141_p13 = pnand %p687_p10, %p185_p11  ;;  %s200_s8 = sshll.u32 %s1039_s7, 4  ;;  %s201_s8 = int_to_ptr.vmem [resolvable:$true] %s200_s8 }
  0x12   : > { %p1150_p4 = pnand %p802_p1, %p1120_p5  ;;  %s1040_s10 = smov [#allocation6]  }
  0x13   : > { %s1414_s6 = scalar_select %p1141_p13, 1, 0 }
  0x14   : > { %p785_p0 = pneg %p1141_p13  ;;  %s210_s11 = sshll.u32 %s1040_s10, 4  ;;  %s1160_s11 = int_to_ptr.vmem [resolvable:$true] %s210_s11 }
  0x15   : > { %s1415_s9 = scalar_select %p1150_p4, 1, 0 }
  0x16   : > { %p1156_p2 = pnand %p785_p0, %p1403_p3  ;;  %s861_s15 = scalar_lea.hbm %s1397_s0, 128 }
  0x17   : > { %p862_p5 = scmp.ne.s32.totalorder %s1397_s0, %s861_s15  ;;  %p868_p1 = scmp.lt.u32.totalorder %s861_s15, %s1397_s0 }
  0x18   : > { %p863_p6 = pneg %p1156_p2 }
  0x1a   : > { %p864_p10 = pnand %p863_p6, %p862_p5 }
  0x1c   : > { %p865_p11 = pneg %p864_p10 }
  0x1e   : > { %p870_p0 = pnand %p868_p1, %p865_p11 }
  0x20   : > { %873 = shalt.err (!%p870_p0)
}
  0x21   : > { %s874_s7 = scalar_lea.vmem %s201_s8, 128  ;;  %p882_p8 = scmp.lt.s32.totalorder %s201_s8, %s201_s8 }
  0x22   : > { %p875_p12 = scmp.ne.s32.totalorder %s201_s8, %s874_s7  ;;  %p883_p7 = scmp.lt.s32.totalorder %s874_s7, %s874_s7 }
  0x24   : > { %p877_p3 = pnand %p875_p12, %p863_p6  ;;  %p884_p13 = por %p883_p7, %p882_p8 }
  0x26   : > { %p878_p9 = pneg %p877_p3 }
  0x28   : > { %p885_p4 = pnand %p884_p13, %p878_p9 }
  0x2a   : > { %888 = shalt.err (!%p885_p4)
}
  0x2b   : > { %788 = dma.hbm_to_vmem [thread:$0]  (!%p1156_p2), %s1397_s0, 128, %s201_s8, [#allocation4]  }
  0x2c   : > { %s889_s16 = scalar_lea.hbm %s1398_s1, 4096 }
  0x2d   : > { %p890_p3 = scmp.ne.s32.totalorder %s1398_s1, %s889_s16  ;;  %p896_p9 = scmp.lt.u32.totalorder %s889_s16, %s1398_s1 }
  0x2f   : > { %p892_p7 = pnand %p890_p3, %p863_p6 }
  0x31   : > { %p893_p8 = pneg %p892_p7 }
  0x33   : > { %p898_p12 = pnand %p896_p9, %p893_p8 }
  0x35   : > { %901 = shalt.err (!%p898_p12)
}
  0x36   : > { %s902_s8 = scalar_lea.vmem %s1160_s11, 4096  ;;  %p910_p10 = scmp.lt.s32.totalorder %s1160_s11, %s1160_s11 }
  0x37   : > { %p903_p13 = scmp.ne.s32.totalorder %s1160_s11, %s902_s8  ;;  %p911_p11 = scmp.lt.s32.totalorder %s902_s8, %s902_s8 }
  0x39   : > { %p905_p4 = pnand %p903_p13, %p863_p6  ;;  %p912_p1 = por %p911_p11, %p910_p10 }
  0x3b   : > { %p906_p5 = pneg %p905_p4 }
  0x3d   : > { %p913_p0 = pnand %p912_p1, %p906_p5 }
  0x3f   : > { %916 = shalt.err (!%p913_p0)
}
  0x40   : > { %s1408_s10 = smov 256   ;;  %s1409_s13 = smov 16  }
  0x41   : > { %791 = dma.hbm_to_vmem [thread:$0]  (!%p1156_p2), %s1398_s1, 4096, %s1160_s11, [#allocation7], %s1408_s10, %s1408_s10, %s1409_s13  }
  0x42   : > { %s227_s16 = sand.u32 1, %s1037_s23   ;;  %s29_s17 = sadd.s32 1, %s1033_s22 }
  0x43   : > { %s229_s25 = sand.u32 1, %s1025_s20   ;;  %p30_p6 = scmp.ge.s32.totalorder %s29_s17, 2 }
  0x44   : > { %s691_s27 = sshll.u32 %s229_s25, 8  ;;  %s707_s7 = sshll.u32 %s1033_s22, 8 }
  0x45   : > { %s1437_s17 = smov (%p30_p6, %s29_s17), 0  ;;  %s1221_s12 = scalar_lea.hbm %s1400_s3, %s707_s7 }
  0x46   : > { %s231_s11 = scalar_lea.vmem [#allocation8], %s691_s27  ;;  %s104_s15 = ssub.s32 %s1033_s22, %s1437_s17 }
  0x47   : > { %s238_s14 = sshll.u32 %s231_s11, 4  ;;  %p1227_p2 = scmp.eq.s32.totalorder %s104_s15, 0  ;;  %s1225_s14 = int_to_ptr.vmem [resolvable:$true] %s238_s14 }
  0x48   : > { %s1231_s10 = scalar_lea.sflag [#allocation4], %s227_s16  ;;  %s917_s13 = scalar_lea.hbm %s1221_s12, 4096 }
  0x49   : > { %p918_p3 = scmp.ne.s32.totalorder %s1221_s12, %s917_s13  ;;  %p1418_p7 = scmp.ne.s32.totalorder %s1415_s9, 0 }
  0x4a   : > { %s922_s7 = scalar_lea.hbm %s1400_s3, 8192  ;;  %p923_p13 = scmp.lt.u32.totalorder %s1221_s12, %s1400_s3 }
  0x4b   : > { %p919_p8 = pneg %p1418_p7  ;;  %p924_p4 = scmp.lt.u32.totalorder %s922_s7, %s917_s13 }
  0x4c   : > { %p926_p10 = scmp.lt.u32.totalorder %s917_s13, %s1221_s12 }
  0x4d   : > { %p920_p9 = pnand %p919_p8, %p918_p3  ;;  %p925_p5 = por %p924_p4, %p923_p13 }
  0x4f   : > { %p921_p12 = pneg %p920_p9  ;;  %p927_p11 = por %p926_p10, %p925_p5 }
  0x51   : > { %p928_p1 = pnand %p927_p11, %p921_p12 }
  0x53   : > { %931 = shalt.err (!%p928_p1)
}
  0x54   : > { %s932_s16 = scalar_lea.vmem %s1225_s14, 4096  ;;  %s1043_s15 = smov [#allocation8]  }
  0x55   : > { %p933_p0 = scmp.ne.s32.totalorder %s1225_s14, %s932_s16  ;;  %s937_s26 = sshll.u32 %s1043_s15, 4  ;;  %s938_s26 = int_to_ptr.vmem [resolvable:$false] %s937_s26 }
  0x56   : > { %s939_s27 = scalar_lea.vmem %s938_s26, 8192  ;;  %p940_p9 = scmp.lt.s32.totalorder %s1225_s14, %s938_s26 }
  0x57   : > { %p935_p6 = pnand %p933_p0, %p919_p8  ;;  %p941_p13 = scmp.lt.s32.totalorder %s939_s27, %s932_s16 }
  0x59   : > { %p936_p3 = pneg %p935_p6  ;;  %p942_p4 = por %p941_p13, %p940_p9 }
  0x5b   : > { %p943_p5 = pnand %p942_p4, %p936_p3 }
  0x5d   : > { %946 = shalt.err (!%p943_p5)
}
  0x5e   : > { %s1044_s13 = smov 512   ;;  %s1419_s7 = smov 16  }
  0x5f   : > { %s1420_s8 = smov 256   ;;  %s1421_s11 = sadd.s32 1, %s1025_s20 }
  0x60   : > { %795 = dma.hbm_to_vmem [thread:$0]  (!%p1418_p7), %s1221_s12, 4096, %s1225_s14, %s1231_s10, %s1044_s13, %s1420_s8, %s1419_s7  }
  0x61   : > { %s1266_s15 = scalar_select %p1227_p2, %s1025_s20, %s1421_s11  }
  0x62   : > { %p1422_p8 = scmp.ne.s32.totalorder %s1414_s6, 0 }
  0x63   : > { %p1423_p12 = scmp.eq.s32.totalorder (!%p1422_p8), %s1109_s24, 0 }
  0x64   : > { %258 = sbr.rel (%p1422_p8) target bundleno = 635 (0x27b), region = 40 }
  0x6b   : > { %1000 = dma.done.wait (%p1423_p12), [#allocation4], 128   ;;  %p1424_p10 = pmov %p1423_p12 }
  0x6d   : > { %1002 = vsyncadd (%p1424_p10), [#allocation4], 4294967168  ;;  %p1425_p11 = pmov %p1424_p10 }
  0x6e   : > { %p1426_p1 = pmov %p1424_p10 }
  0x6f   : > { %1004 = dma.done.wait (%p1425_p11), [#allocation7], 4096  }
  0x70   : > { %1006 = vsyncadd (%p1426_p1), [#allocation7], 4294963200  ;;  %s268_s9 = sand.u32 1, %s1109_s24   ;;  %s1280_s10 = sand.u32 1, %s1021_s19  }
  0x71   : > { %s697_s6 = sshll.u32 %s1280_s10, 8  ;;  %s269_s12 = scalar_lea.sflag [#allocation4], %s268_s9 }
  0x72   : > { %s1283_s14 = scalar_lea.vmem [#allocation8], %s697_s6  ;;  %p1427_p2 = scmp.ne.s32.totalorder %s1411_s28, 0 }
  0x74   : > { %1008 = dma.done.wait (%p1427_p2), %s269_s12, 4096  }
  0x75   : > { %1010 = vsyncadd (%p1427_p2), %s269_s12, 4294963200  ;;  %s698_s25 = sshll.u32 %s1280_s10, 4  ;;  %s699_s16 = sshll.u32 %s1029_s21, 1 }
  0x76   : > { %p305_p7 = scmp.lt.s32.totalorder %s699_s16, 3  ;;  %s1297_s13 = scalar_lea.vmem [#allocation9], %s698_s25 }
  0x77   : > { %p700_p0 = scmp.ne.s32.totalorder %s1029_s21, 0 }
  0x78   : > { %s1439_s16 = smov (!%p305_p7, %s699_s16), 3  ;;  %v316_v0 = vld [vmem:[#allocation6 + $0x8] sm:$0xff] (!%p700_p0)  ;;  %v318_v1 = vld [vmem:[#allocation6 + $0x18] sm:$0xff] (!%p700_p0)  ;;  %v315_v2 = vld [vmem:[#allocation6] sm:$0xff] (!%p700_p0)  ;;  %v1045_v7 = vmov (!%p700_p0), 0.0   ;;  %v349_v50 = vlaneseq (!%p700_p0) }
  0x79   : > { %s307_s27 = scalar_lea.vmem %s1401_s4, %s1439_s16  ;;  %313 = sbr.rel (%p700_p0) target bundleno = 371 (0x173), region = 56  ;;  %v709_v3 = vpack.c.bf16 (!%p700_p0), %v318_v1, %v316_v0  ;;  %v317_v4 = vld [vmem:[#allocation6 + $0x10] sm:$0xff] (!%p700_p0)  ;;  %v320_v5 = vld [vmem:[#allocation6 + $0x28] sm:$0xff] (!%p700_p0)  ;;  %v322_v6 = vld [vmem:[#allocation6 + $0x38] sm:$0xff] (!%p700_p0)  ;;  %423 = vmatprep.mubr.f32.mxu0 (!%p700_p0), %v1045_v7 }
  0x7a   : > { %v711_v8 = vpack.c.bf16 (!%p700_p0), %v317_v4, %v315_v2  ;;  %v713_v9 = vpack.c.bf16 (!%p700_p0), %v322_v6, %v320_v5  ;;  %v319_v10 = vld [vmem:[#allocation6 + $0x20] sm:$0xff] (!%p700_p0)  ;;  %v321_v11 = vld [vmem:[#allocation6 + $0x30] sm:$0xff] (!%p700_p0)  ;;  %v324_v12 = vld [vmem:[#allocation6 + $0x48] sm:$0xff] (!%p700_p0)  ;;  %v350_v51 = vshrl.u32 (!%p700_p0), %v349_v50, 7 }
  0x7b   : > { %710 = vmatprep.subr.bf16.mxu0 (!%p700_p0), %v709_v3  ;;  %v326_v13 = vld [vmem:[#allocation6 + $0x58] sm:$0xff] (!%p700_p0)  ;;  %v715_v14 = vpack.c.bf16 (!%p700_p0), %v321_v11, %v319_v10  ;;  %v323_v16 = vld [vmem:[#allocation6 + $0x40] sm:$0xff] (!%p700_p0)  ;;  %v325_v17 = vld [vmem:[#allocation6 + $0x50] sm:$0xff] (!%p700_p0) }
  0x7c   : > { %712 = vmatpush1.bf16.msra.mxu0 (!%p700_p0), %v711_v8  ;;  %v717_v15 = vpack.c.bf16 (!%p700_p0), %v326_v13, %v324_v12  ;;  %v328_v18 = vld [vmem:[#allocation6 + $0x68] sm:$0xff] (!%p700_p0)  ;;  %v330_v19 = vld [vmem:[#allocation6 + $0x78] sm:$0xff] (!%p700_p0)  ;;  %v719_v20 = vpack.c.bf16 (!%p700_p0), %v325_v17, %v323_v16  ;;  %v327_v22 = vld [vmem:[#allocation6 + $0x60] sm:$0xff] (!%p700_p0)  ;;  %v351_v52 = vsub.s32 (!%p700_p0), 0, %v350_v51  ;;  %v355_v54 = vsub.s32 (!%p700_p0), 1, %v350_v51 }
  0x7d   : > { %714 = vmatprep.subr.bf16.mxu0 (!%p700_p0), %v713_v9  ;;  %v721_v21 = vpack.c.bf16 (!%p700_p0), %v330_v19, %v328_v18  ;;  %v329_v23 = vld [vmem:[#allocation6 + $0x70] sm:$0xff] (!%p700_p0)  ;;  %v332_v24 = vld [vmem:[#allocation6 + $0x88] sm:$0xff] (!%p700_p0)  ;;  %v334_v25 = vld [vmem:[#allocation6 + $0x98] sm:$0xff] (!%p700_p0) }
  0x7e   : > { %v723_v26 = vpack.c.bf16 (!%p700_p0), %v329_v23, %v327_v22  ;;  %v725_v27 = vpack.c.bf16 (!%p700_p0), %v334_v25, %v332_v24  ;;  %v331_v28 = vld [vmem:[#allocation6 + $0x80] sm:$0xff] (!%p700_p0)  ;;  %v333_v29 = vld [vmem:[#allocation6 + $0x90] sm:$0xff] (!%p700_p0)  ;;  %v336_v30 = vld [vmem:[#allocation6 + $0xa8] sm:$0xff] (!%p700_p0) }
  0x7f   : > { %v338_v31 = vld [vmem:[#allocation6 + $0xb8] sm:$0xff] (!%p700_p0)  ;;  %v727_v32 = vpack.c.bf16 (!%p700_p0), %v333_v29, %v331_v28  ;;  %v335_v34 = vld [vmem:[#allocation6 + $0xa0] sm:$0xff] (!%p700_p0)  ;;  %v337_v35 = vld [vmem:[#allocation6 + $0xb0] sm:$0xff] (!%p700_p0) }
  0x80   : > { %716 = vmatpush1.bf16.msra.mxu0 %v715_v14  ;;  %v729_v33 = vpack.c.bf16 %v338_v31, %v336_v30  ;;  %v340_v36 = vld [vmem:[#allocation6 + $0xc8] sm:$0xff]  ;;  %v342_v37 = vld [vmem:[#allocation6 + $0xd8] sm:$0xff]  ;;  %v731_v38 = vpack.c.bf16 %v337_v35, %v335_v34  ;;  %v339_v40 = vld [vmem:[#allocation6 + $0xc0] sm:$0xff] }
  0x81   : > { %718 = vmatprep.subr.bf16.mxu0 %v717_v15  ;;  %v733_v39 = vpack.c.bf16 %v342_v37, %v340_v36  ;;  %v341_v41 = vld [vmem:[#allocation6 + $0xd0] sm:$0xff]  ;;  %v344_v42 = vld [vmem:[#allocation6 + $0xe8] sm:$0xff]  ;;  %v346_v43 = vld [vmem:[#allocation6 + $0xf8] sm:$0xff] }
  0x82   : > { %v735_v44 = vpack.c.bf16 %v341_v41, %v339_v40  ;;  %v737_v45 = vpack.c.bf16 %v346_v43, %v344_v42  ;;  %v343_v46 = vld [vmem:[#allocation6 + $0xe0] sm:$0xff]  ;;  %v345_v47 = vld [vmem:[#allocation6 + $0xf0] sm:$0xff]  ;;  %v314_v49 = vld [vmem:[#allocation3] sm:$0xff] }
  0x83   : > { %v739_v48 = vpack.c.bf16 %v345_v47, %v343_v46  ;;  %v347_v53 = vld [vmem:[%s1399_s2] sm:$0x3] }
  0x84   : > { %720 = vmatpush1.bf16.msra.mxu0 %v719_v20  ;;  %v352_v55 = vrot.slane %v347_v53, %v351_v52  ;;  %v356_v56 = vrot.slane %v347_v53, %v355_v54 }
  0x85   : > { %722 = vmatprep.subr.bf16.mxu0 %v721_v21 }
  0x88   : > { %724 = vmatpush1.bf16.msra.mxu0 %v723_v26 }
  0x89   : > { %726 = vmatprep.subr.bf16.mxu0 %v725_v27 }
  0x8c   : > { %728 = vmatpush1.bf16.msra.mxu0 %v727_v32 }
  0x8d   : > { %730 = vmatprep.subr.bf16.mxu0 %v729_v33 }
  0x90   : > { %732 = vmatpush1.bf16.msra.mxu0 %v731_v38 }
  0x91   : > { %734 = vmatprep.subr.bf16.mxu0 %v733_v39 }
  0x94   : > { %736 = vmatpush1.bf16.msra.mxu0 %v735_v44 }
  0x95   : > { %738 = vmatprep.subr.bf16.mxu0 %v737_v45 }
  0x98   : > { %740 = vmatpush1.bf16.msra.mxu0 %v739_v48 }
  0x9b   : > { %424 = vmatmul.mubr.f32.vlgmr.msra.gmra.mrb[0].mxu0 %v314_v49 }
 0x16e   : > { %v425_v57 = vpop.f32.mrb[0].mxu0 }
 0x16f   : > { %v426_v58 = vadd.f32 %v425_v57, %v352_v55  ;;  %v427_v59 = vpop.f32.mrb[1].mxu0 }
 0x170   : > { %v428_v60 = vadd.f32 %v427_v59, %v356_v56 }
 0x171   : > { %430 = vst [vmem:[#allocation2] sm:$0xff] %v426_v58 }
 0x172   : > { %432 = vst [vmem:[#allocation2 + $0x8] sm:$0xff] %v428_v60 }
 0x173 PF: > { %v439_v61 = vld [vmem:[%s1283_s14 + $0x8] sm:$0xff]  ;;  %v441_v62 = vld [vmem:[%s1283_s14 + $0x18] sm:$0xff]  ;;  %v438_v63 = vld [vmem:[%s1283_s14] sm:$0xff]  ;;  %v1046_v4 = vmov 0.0   ;;  %p433_p6 = scmp.ge.s32.totalorder %s1029_s21, 1  ;;  %v472_v47 = vlaneseq  ;;  %s572_s25 = sshll.u32 %s1297_s13, 4  ;;  %s1348_s25 = int_to_ptr.vmem [resolvable:$true] %s572_s25 }
 0x174   : > { %v741_v0 = vpack.c.bf16 %v441_v62, %v439_v61  ;;  %v440_v1 = vld [vmem:[%s1283_s14 + $0x10] sm:$0xff]  ;;  %v443_v2 = vld [vmem:[%s1283_s14 + $0x28] sm:$0xff]  ;;  %v445_v3 = vld [vmem:[%s1283_s14 + $0x38] sm:$0xff]  ;;  %546 = vmatprep.mubr.f32.mxu0 %v1046_v4  ;;  %s556_s16 = scalar_lea.sflag [#allocation5], %s1280_s10  ;;  %p1428_p9 = scmp.ne.s32.totalorder %s1412_s29, 0 }
 0x175   : > { %v743_v5 = vpack.c.bf16 %v440_v1, %v438_v63  ;;  %v745_v6 = vpack.c.bf16 %v445_v3, %v443_v2  ;;  %v442_v7 = vld [vmem:[%s1283_s14 + $0x20] sm:$0xff]  ;;  %v444_v8 = vld [vmem:[%s1283_s14 + $0x30] sm:$0xff]  ;;  %v447_v9 = vld [vmem:[%s1283_s14 + $0x48] sm:$0xff]  ;;  %s434_s8 = scalar_select %p433_p6, 1, 0  ;;  %v473_v48 = vshrl.u32 %v472_v47, 7 }
 0x176   : > { %742 = vmatprep.subr.bf16.mxu0 %v741_v0  ;;  %v449_v10 = vld [vmem:[%s1283_s14 + $0x58] sm:$0xff]  ;;  %v747_v11 = vpack.c.bf16 %v444_v8, %v442_v7  ;;  %v446_v13 = vld [vmem:[%s1283_s14 + $0x40] sm:$0xff]  ;;  %v448_v14 = vld [vmem:[%s1283_s14 + $0x50] sm:$0xff] }
 0x177   : > { %744 = vmatpush1.bf16.msra.mxu0 %v743_v5  ;;  %v749_v12 = vpack.c.bf16 %v449_v10, %v447_v9  ;;  %v451_v15 = vld [vmem:[%s1283_s14 + $0x68] sm:$0xff]  ;;  %v453_v16 = vld [vmem:[%s1283_s14 + $0x78] sm:$0xff]  ;;  %v751_v17 = vpack.c.bf16 %v448_v14, %v446_v13  ;;  %v450_v19 = vld [vmem:[%s1283_s14 + $0x60] sm:$0xff]  ;;  %s701_s11 = sshll.u32 %s434_s8, 3  ;;  %v474_v49 = vsub.s32 0, %v473_v48  ;;  %v478_v51 = vsub.s32 1, %v473_v48 }
 0x178   : > { %746 = vmatprep.subr.bf16.mxu0 %v745_v6  ;;  %v753_v18 = vpack.c.bf16 %v453_v16, %v451_v15  ;;  %v452_v20 = vld [vmem:[%s1283_s14 + $0x70] sm:$0xff]  ;;  %v455_v21 = vld [vmem:[%s1283_s14 + $0x88] sm:$0xff]  ;;  %v457_v22 = vld [vmem:[%s1283_s14 + $0x98] sm:$0xff]  ;;  %s436_s9 = scalar_lea.vmem [#allocation2], %s701_s11 }
 0x179   : > { %v755_v23 = vpack.c.bf16 %v452_v20, %v450_v19  ;;  %v757_v24 = vpack.c.bf16 %v457_v22, %v455_v21  ;;  %v454_v25 = vld [vmem:[%s1283_s14 + $0x80] sm:$0xff]  ;;  %v456_v26 = vld [vmem:[%s1283_s14 + $0x90] sm:$0xff]  ;;  %v459_v27 = vld [vmem:[%s1283_s14 + $0xa8] sm:$0xff] }
 0x17a   : > { %v461_v28 = vld [vmem:[%s1283_s14 + $0xb8] sm:$0xff]  ;;  %v759_v29 = vpack.c.bf16 %v456_v26, %v454_v25  ;;  %v458_v31 = vld [vmem:[%s1283_s14 + $0xa0] sm:$0xff]  ;;  %v460_v32 = vld [vmem:[%s1283_s14 + $0xb0] sm:$0xff] }
 0x17b   : > { %748 = vmatpush1.bf16.msra.mxu0 %v747_v11  ;;  %v761_v30 = vpack.c.bf16 %v461_v28, %v459_v27  ;;  %v463_v33 = vld [vmem:[%s1283_s14 + $0xc8] sm:$0xff]  ;;  %v465_v34 = vld [vmem:[%s1283_s14 + $0xd8] sm:$0xff]  ;;  %v763_v35 = vpack.c.bf16 %v460_v32, %v458_v31  ;;  %v462_v37 = vld [vmem:[%s1283_s14 + $0xc0] sm:$0xff] }
 0x17c   : > { %750 = vmatprep.subr.bf16.mxu0 %v749_v12  ;;  %v765_v36 = vpack.c.bf16 %v465_v34, %v463_v33  ;;  %v464_v38 = vld [vmem:[%s1283_s14 + $0xd0] sm:$0xff]  ;;  %v467_v39 = vld [vmem:[%s1283_s14 + $0xe8] sm:$0xff]  ;;  %v469_v40 = vld [vmem:[%s1283_s14 + $0xf8] sm:$0xff] }
 0x17d   : > { %v767_v41 = vpack.c.bf16 %v464_v38, %v462_v37  ;;  %v769_v42 = vpack.c.bf16 %v469_v40, %v467_v39  ;;  %v466_v43 = vld [vmem:[%s1283_s14 + $0xe0] sm:$0xff]  ;;  %v468_v44 = vld [vmem:[%s1283_s14 + $0xf0] sm:$0xff]  ;;  %v437_v46 = vld [vmem:[%s436_s9] sm:$0xff]  ;;  %s708_s14 = sshll.u32 %s1029_s21, 8  ;;  %s1047_s21 = smov [#allocation9]  }
 0x17e   : > { %v771_v45 = vpack.c.bf16 %v468_v44, %v466_v43  ;;  %v470_v50 = vld [vmem:[%s307_s27] sm:$0x3]  ;;  %s1346_s28 = scalar_lea.hbm %s1402_s5, %s708_s14  ;;  %s947_s27 = scalar_lea.vmem %s1348_s25, 256 }
 0x17f   : > { %752 = vmatpush1.bf16.msra.mxu0 %v751_v17  ;;  %v475_v52 = vrot.slane %v470_v50, %v474_v49  ;;  %v479_v53 = vrot.slane %v470_v50, %v478_v51  ;;  %p948_p3 = scmp.ne.s32.totalorder %s1348_s25, %s947_s27  ;;  %s951_s7 = sshll.u32 %s1047_s21, 4  ;;  %s952_s7 = int_to_ptr.vmem [resolvable:$false] %s951_s7 }
 0x180   : > { %754 = vmatprep.subr.bf16.mxu0 %v753_v18  ;;  %s953_s8 = scalar_lea.vmem %s952_s7, 512  ;;  %p954_p5 = scmp.lt.s32.totalorder %s1348_s25, %s952_s7 }
 0x181   : > { %p949_p13 = pnand %p948_p3, %p1428_p9  ;;  %p955_p8 = scmp.lt.s32.totalorder %s953_s8, %s947_s27 }
 0x183   : > { %756 = vmatpush1.bf16.msra.mxu0 %v755_v23  ;;  %p950_p4 = pneg %p949_p13  ;;  %p956_p12 = por %p955_p8, %p954_p5 }
 0x184   : > { %758 = vmatprep.subr.bf16.mxu0 %v757_v24 }
 0x185   : > { %p957_p10 = pnand %p956_p12, %p950_p4 }
 0x187   : > { %760 = vmatpush1.bf16.msra.mxu0 %v759_v29 }
 0x188   : > { %762 = vmatprep.subr.bf16.mxu0 %v761_v30 }
 0x18b   : > { %764 = vmatpush1.bf16.msra.mxu0 %v763_v35 }
 0x18c   : > { %766 = vmatprep.subr.bf16.mxu0 %v765_v36 }
 0x18f   : > { %768 = vmatpush1.bf16.msra.mxu0 %v767_v41 }
 0x190   : > { %770 = vmatprep.subr.bf16.mxu0 %v769_v42 }
 0x193   : > { %772 = vmatpush1.bf16.msra.mxu0 %v771_v45 }
 0x196   : > { %547 = vmatmul.mubr.f32.vlgmr.msra.gmra.mrb[0].mxu0 %v437_v46 }
 0x269   : > { %v548_v54 = vpop.f32.mrb[0].mxu0 }
 0x26a   : > { %v549_v55 = vadd.f32 %v548_v54, %v475_v52  ;;  %v550_v56 = vpop.f32.mrb[1].mxu0 }
 0x26b   : > { %v551_v57 = vadd.f32 %v550_v56, %v479_v53 }
 0x26c   : > { %553 = vst [vmem:[%s1297_s13] sm:$0xff] %v549_v55 }
 0x26d   : > { %554 = vst [vmem:[%s1297_s13 + $0x8] sm:$0xff] %v551_v57 }
 0x26e   : > { %960 = shalt.err (!%p957_p10)
}
 0x26f   : > { %s961_s10 = scalar_lea.hbm %s1346_s28, 256  ;;  %s965_s9 = scalar_lea.hbm %s1402_s5, 512 }
 0x270   : > { %p962_p11 = scmp.ne.s32.totalorder %s1346_s28, %s961_s10  ;;  %p966_p7 = scmp.lt.u32.totalorder %s1346_s28, %s1402_s5 }
 0x271   : > { %p967_p0 = scmp.lt.u32.totalorder %s965_s9, %s961_s10  ;;  %p969_p3 = scmp.lt.u32.totalorder %s961_s10, %s1346_s28 }
 0x272   : > { %p963_p1 = pnand %p962_p11, %p1428_p9 }
 0x273   : > { %p968_p6 = por %p967_p0, %p966_p7 }
 0x274   : > { %p964_p2 = pneg %p963_p1 }
 0x275   : > { %p970_p13 = por %p969_p3, %p968_p6 }
 0x277   : > { %p971_p4 = pnand %p970_p13, %p964_p2 }
 0x279   : > { %974 = shalt.err (!%p971_p4)
}
 0x27a   : > { %783 = dma.vmem_to_hbm [thread:$0]  (%p1428_p9), %s1348_s25, 256, %s1346_s28, %s556_s16  }
 0x27b PF: > { %s584_s14 = sand.u32 1, %s1017_s18   ;;  %p1429_p5 = scmp.ne.s32.totalorder %s1413_s30, 0 }
 0x27c   : > { %p1430_p8 = scmp.ge.s32.totalorder %s1037_s23, 2  ;;  %s585_s24 = scalar_lea.sflag [#allocation5], %s584_s14 }
 0x27e   : > { %p797_p12 = pnand %p1430_p8, %p1429_p5 }
 0x280   : > { %1012 = dma.done.wait (!%p797_p12), %s585_s24, 256  }
 0x281   : > { %1014 = vsyncadd (!%p797_p12), %s585_s24, 4294967040  ;;  %s20_s23 = sadd.s32 1, %s1037_s23   ;;  %s1431_s18 = smov %s1021_s19 }
 0x282   : > { %p17_p10 = scmp.ge.s32.totalorder %s20_s23, 4   ;;  %s1432_s19 = smov %s1025_s20 }
 0x283   : > { %s1433_s20 = smov %s1266_s15  ;;  %s1434_s21 = smov %s1033_s22 }
 0x284   : > { %s1435_s22 = smov %s1437_s17  ;;  %19 = sbr.rel (!%p17_p10) target bundleno = 6 (0x6), region = 102 }
 0x28b   :  { %590 = vsyncpa [#allocation4], 1 }
 0x28c   :  { %592 = vsyncpa [#allocation4 + $0x1], 1 }
 0x28d   :  { %593 = vsyncpa [#allocation7], 1 }
 0x28e   :  { %594 = vsyncpa [#allocation5], 1 }
 0x28f   :  { %596 = vsyncpa [#allocation5 + $0x1], 1 }

</bundles_post_ra>
